<compile_context>
chip_gen: v7x
topology: tpu7x:2x2x1
jax: 0.10.0
libtpu: 0.0.40
codegen_flags: <defaults>
</compile_context>

<pallas_src>
import math
import jax
import jax.numpy as jnp
from jax.experimental import pallas as pl
from jax.experimental.pallas import tpu as pltpu


def make_kernel(B: int, Lq: int, Lkv: int, H: int, n_heads: int, eps: float = 1e-5):
    # The seg-matrix trick requires heads to be contiguous, equal-size lane groups.
    assert H % n_heads == 0, "hidden_dim must be divisible by n_heads"
    nq = B * Lq

    def kernel(x_ref, w_ref, vec_ref, seg_ref, o_ref):
        x = x_ref[...]                      # (B*Lq + B*Lkv, H): [q rows ; kv rows]
        qf = x[:nq, :]                      # residual input

        bq    = vec_ref[0:1, :]             # (1, H), pre-scaled by 1/sqrt(head_dim)
        bk    = vec_ref[1:2, :]
        bv    = vec_ref[2:3, :]
        bo    = vec_ref[3:4, :]
        gamma = vec_ref[4:5, :]
        beta  = vec_ref[5:6, :]

        # --- single fused in-projection MXU push: (nq+nkv, H) @ (H, 4H) ---
        # weight slab lanes: [wq*scale | wk | wv | wo]
        P = jnp.dot(x, w_ref[...], preferred_element_type=jnp.float32)   # (nq+nkv, 4H)
        Q = P[:nq, 0:H] + bq                                             # (B*Lq,  H)
        K = P[nq:, H:2 * H] + bk                                         # (B*Lkv, H)
        V = P[nq:, 2 * H:3 * H] + bv                                     # (B*Lkv, H)

        # --- per-head attention via segmented-sum (no per-head matmuls) ---
        # seg[d, e] = 1 iff lanes d, e belong to the same head, so (Q*K) @ seg
        # puts each head's dot-product score into every lane of that head
        # (score already includes the folded 1/sqrt(head_dim) scale).
        Q4 = Q.reshape(B, Lq, 1, H)
        K4 = K.reshape(B, 1, Lkv, H)
        V4 = V.reshape(B, 1, Lkv, H)
        QK = (Q4 * K4).reshape(B * Lq * Lkv, H)
        S = jnp.dot(QK, seg_ref[...], preferred_element_type=jnp.float32)
        S4 = S.reshape(B, Lq, Lkv, H)

        m = jnp.max(S4, axis=2, keepdims=True)          # softmax over key axis
        e = jnp.exp(S4 - m)
        denom = jnp.sum(e, axis=2, keepdims=True)
        O = jnp.sum(e * V4, axis=2, keepdims=True)      # unnormalized weighted V
        O = (O * pl.reciprocal(denom, approx=False)).reshape(B * Lq, H)

        # --- output projection (wo lanes of the same slab) + residual + LayerNorm ---
        attn = jnp.dot(O, w_ref[:, 3 * H:4 * H], preferred_element_type=jnp.float32) + bo
        out = qf + attn                                  # dropout == identity (eval)
        mean = jnp.mean(out, axis=-1, keepdims=True)
        var = jnp.mean((out - mean) ** 2, axis=-1, keepdims=True)
        y = (out - mean) * jax.lax.rsqrt(var + eps)
        o_ref[...] = (y * gamma + beta).astype(o_ref.dtype)

    return kernel


def cross_modal_attention_block(q, kv, params, n_heads: int):
    """q: (B, Lq, H), kv: (B, Lkv, H). Returns norm(q + attn(q, kv, kv)).squeeze(1)."""
    B, Lq, H = q.shape
    _, Lkv, _ = kv.shape
    head_dim = H // n_heads
    scale = 1.0 / math.sqrt(head_dim)

    # ---- host-side parameter / layout packing (done once) ----
    # one lane-dense (H, 4H) weight slab: [wq*scale | wk | wv | wo]
    w_slab = jnp.concatenate(
        [params["wqT"] * scale, params["wkT"], params["wvT"], params["woT"]], axis=1)
    # packed bias / LayerNorm vectors (padded to 8 sublane rows)
    vecs = jnp.concatenate(
        [params["bq"] * scale, params["bk"], params["bv"], params["bo"],
         params["gamma"], params["beta"], jnp.zeros((2, H), jnp.float32)], axis=0)
    # same-head lane mask, precomputed host-side (hoisted out of the kernel body)
    head_id = jnp.arange(H, dtype=jnp.int32) // head_dim
    seg = (head_id[:, None] == head_id[None, :]).astype(jnp.float32)      # (H, H)

    # activations: q rows then kv rows, flattened to one row slab
    xf = jnp.concatenate([q.reshape(B * Lq, H), kv.reshape(B * Lkv, H)], axis=0)

    kernel = make_kernel(B, Lq, Lkv, H, n_heads)

    nrows = B * (Lq + Lkv)
    flops = (2 * nrows * H * 4 * H                 # fused in-projection
             + 2 * B * Lq * Lkv * H * H            # segmented score matmul
             + 2 * B * Lq * H * H                  # output projection
             + 12 * B * Lq * Lkv * H)              # softmax / weighted-V / LN elementwise
    transcendentals = B * Lq * Lkv * H + 4 * B * Lq
    bytes_accessed = 4 * (xf.size + w_slab.size + vecs.size + seg.size + B * Lq * H)

    vmem = pl.BlockSpec(memory_space=pltpu.MemorySpace.VMEM)
    out = pl.pallas_call(
        kernel,
        out_shape=jax.ShapeDtypeStruct((B * Lq, H), jnp.float32),
        in_specs=[vmem, vmem, vmem, vmem],
        out_specs=vmem,
        cost_estimate=pl.CostEstimate(
            flops=flops, transcendentals=transcendentals, bytes_accessed=bytes_accessed),
    )(xf, w_slab, vecs, seg)

    # PyTorch .squeeze(1): drops the seq dim only when Lq == 1
    if Lq == 1:
        return out                      # already (B, H)
    return out.reshape(B, Lq, H)


def reference(q, kv, params, n_heads: int):
    """Pure-jnp reference mirroring nn.MultiheadAttention (eval) + residual + LayerNorm."""
    B, Lq, H = q.shape
    hd = H // n_heads
    Q = q @ params["wqT"] + params["bq"][0]
    K = kv @ params["wkT"] + params["bk"][0]
    V = kv @ params["wvT"] + params["bv"][0]
    Qh = Q.reshape(B, Lq, n_heads, hd).transpose(0, 2, 1, 3)
    Kh = K.reshape(B, -1, n_heads, hd).transpose(0, 2, 1, 3)
    Vh = V.reshape(B, -1, n_heads, hd).transpose(0, 2, 1, 3)
    S = jnp.einsum("bhqd,bhkd->bhqk", Qh, Kh) / math.sqrt(hd)
    P = jax.nn.softmax(S, axis=-1)
    O = jnp.einsum("bhqk,bhkd->bhqd", P, Vh).transpose(0, 2, 1, 3).reshape(B, Lq, H)
    attn = O @ params["woT"] + params["bo"][0]
    out = q + attn
    mean = out.mean(-1, keepdims=True)
    var = ((out - mean) ** 2).mean(-1, keepdims=True)
    y = (out - mean) / jnp.sqrt(var + 1e-5)
    y = y * params["gamma"][0] + params["beta"][0]
    if Lq == 1:
        y = y[:, 0, :]
    return y


if __name__ == "__main__":
    # Shapes implied by the module: hidden_dim=32, n_heads=4, single query token
    # (so .squeeze(1) actually drops the seq dim), a few kv tokens.
    B, Lq, Lkv, H, n_heads = 2, 1, 8, 32, 4

    key = jax.random.PRNGKey(0)
    keys = jax.random.split(key, 12)
    sd = 1.0 / math.sqrt(H)

    params = {
        # stored pre-transposed: projection is x @ W.T in torch == x @ wT here
        "wqT": jax.random.normal(keys[0], (H, H), jnp.float32) * sd,
        "wkT": jax.random.normal(keys[1], (H, H), jnp.float32) * sd,
        "wvT": jax.random.normal(keys[2], (H, H), jnp.float32) * sd,
        "woT": jax.random.normal(keys[3], (H, H), jnp.float32) * sd,
        "bq": jax.random.normal(keys[4], (1, H), jnp.float32) * 0.02,
        "bk": jax.random.normal(keys[5], (1, H), jnp.float32) * 0.02,
        "bv": jax.random.normal(keys[6], (1, H), jnp.float32) * 0.02,
        "bo": jax.random.normal(keys[7], (1, H), jnp.float32) * 0.02,
        "gamma": jnp.ones((1, H), jnp.float32),
        "beta": jnp.zeros((1, H), jnp.float32),
    }

    q = jax.random.normal(keys[8], (B, Lq, H), jnp.float32)
    kv = jax.random.normal(keys[9], (B, Lkv, H), jnp.float32)

    out = cross_modal_attention_block(q, kv, params, n_heads)
    out = jax.block_until_ready(out)

    ref = reference(q, kv, params, n_heads)
    assert out.shape == ref.shape == (B, H), (out.shape, ref.shape)
    # Exact reciprocal in the softmax normalization -> tight f32 tolerance.
    assert jnp.allclose(out, ref, atol=1e-4, rtol=1e-4), float(jnp.max(jnp.abs(out - ref)))

    # TODO(synk): nn.Dropout / attention-dropout train-mode masking is not
    # implemented (eval-mode identity only).
    print("KERNEL_OK")
</pallas_src>

<mosaic_0001>
module attributes {stable_mosaic.version = 11 : i64} {
  func.func @kernel(%arg0: memref<18x32xf32, #tpu.memory_space<vmem>>, %arg1: memref<32x128xf32, #tpu.memory_space<vmem>>, %arg2: memref<8x32xf32, #tpu.memory_space<vmem>>, %arg3: memref<32x32xf32, #tpu.memory_space<vmem>>, %arg4: memref<2x32xf32, #tpu.memory_space<vmem>>) attributes {dimension_semantics = [], scalar_prefetch = 0 : i64, scratch_operands = 0 : i64, tpu.core_type = #tpu.core_type<tc>} {
    %c0 = arith.constant 0 : index
    %c0_0 = arith.constant 0 : index
    %0 = vector.load %arg0[%c0, %c0_0] : memref<18x32xf32, #tpu.memory_space<vmem>>, vector<18x32xf32>
    %1 = vector.extract_strided_slice %0 {offsets = [0, 0], sizes = [2, 32], strides = [1, 1]} : vector<18x32xf32> to vector<2x32xf32>
    %c0_1 = arith.constant 0 : index
    %c0_2 = arith.constant 0 : index
    %2 = vector.load %arg2[%c0_1, %c0_2] : memref<8x32xf32, #tpu.memory_space<vmem>>, vector<1x32xf32>
    %c1 = arith.constant 1 : index
    %c0_3 = arith.constant 0 : index
    %3 = vector.load %arg2[%c1, %c0_3] : memref<8x32xf32, #tpu.memory_space<vmem>>, vector<1x32xf32>
    %c2 = arith.constant 2 : index
    %c0_4 = arith.constant 0 : index
    %4 = vector.load %arg2[%c2, %c0_4] : memref<8x32xf32, #tpu.memory_space<vmem>>, vector<1x32xf32>
    %c3 = arith.constant 3 : index
    %c0_5 = arith.constant 0 : index
    %5 = vector.load %arg2[%c3, %c0_5] : memref<8x32xf32, #tpu.memory_space<vmem>>, vector<1x32xf32>
    %c4 = arith.constant 4 : index
    %c0_6 = arith.constant 0 : index
    %6 = vector.load %arg2[%c4, %c0_6] : memref<8x32xf32, #tpu.memory_space<vmem>>, vector<1x32xf32>
    %c5 = arith.constant 5 : index
    %c0_7 = arith.constant 0 : index
    %7 = vector.load %arg2[%c5, %c0_7] : memref<8x32xf32, #tpu.memory_space<vmem>>, vector<1x32xf32>
    %c0_8 = arith.constant 0 : index
    %c0_9 = arith.constant 0 : index
    %8 = vector.load %arg1[%c0_8, %c0_9] : memref<32x128xf32, #tpu.memory_space<vmem>>, vector<32x128xf32>
    %cst = arith.constant dense<0.000000e+00> : vector<18x128xf32>
    %9 = tpu.matmul %0, %8, %cst {dimension_numbers = #tpu.dot_dimension_numbers<[1], [0], [0], [1], [0, 0, 1, 1], [], []>} : vector<18x32xf32>, vector<32x128xf32>, vector<18x128xf32> -> vector<18x128xf32>
    %10 = vector.extract_strided_slice %9 {offsets = [0, 0], sizes = [2, 32], strides = [1, 1]} : vector<18x128xf32> to vector<2x32xf32>
    %11 = vector.broadcast %2 : vector<1x32xf32> to vector<2x32xf32>
    %12 = arith.addf %10, %11 : vector<2x32xf32>
    %13 = vector.extract_strided_slice %9 {offsets = [2, 32], sizes = [16, 32], strides = [1, 1]} : vector<18x128xf32> to vector<16x32xf32>
    %14 = vector.broadcast %3 : vector<1x32xf32> to vector<16x32xf32>
    %15 = arith.addf %13, %14 : vector<16x32xf32>
    %16 = vector.extract_strided_slice %9 {offsets = [2, 64], sizes = [16, 32], strides = [1, 1]} : vector<18x128xf32> to vector<16x32xf32>
    %17 = vector.broadcast %4 : vector<1x32xf32> to vector<16x32xf32>
    %18 = arith.addf %16, %17 : vector<16x32xf32>
    %19 = vector.shape_cast %12 : vector<2x32xf32> to vector<2x1x1x32xf32>
    %20 = vector.shape_cast %15 : vector<16x32xf32> to vector<2x1x8x32xf32>
    %21 = vector.shape_cast %18 : vector<16x32xf32> to vector<2x1x8x32xf32>
    %22 = vector.broadcast %19 : vector<2x1x1x32xf32> to vector<2x1x8x32xf32>
    %23 = arith.mulf %22, %20 : vector<2x1x8x32xf32>
    %24 = vector.shape_cast %23 : vector<2x1x8x32xf32> to vector<16x32xf32>
    %c0_10 = arith.constant 0 : index
    %c0_11 = arith.constant 0 : index
    %25 = vector.load %arg3[%c0_10, %c0_11] : memref<32x32xf32, #tpu.memory_space<vmem>>, vector<32x32xf32>
    %cst_12 = arith.constant dense<0.000000e+00> : vector<16x32xf32>
    %26 = tpu.matmul %24, %25, %cst_12 {dimension_numbers = #tpu.dot_dimension_numbers<[1], [0], [0], [1], [0, 0, 1, 1], [], []>} : vector<16x32xf32>, vector<32x32xf32>, vector<16x32xf32> -> vector<16x32xf32>
    %27 = vector.shape_cast %26 : vector<16x32xf32> to vector<2x1x8x32xf32>
    %cst_13 = arith.constant dense<0xFF800000> : vector<2x1x32xf32>
    %28 = vector.multi_reduction <maximumf>, %27, %cst_13 [2] : vector<2x1x8x32xf32> to vector<2x1x32xf32>
    %29 = vector.shape_cast %28 : vector<2x1x32xf32> to vector<2x1x1x32xf32>
    %30 = vector.broadcast %29 : vector<2x1x1x32xf32> to vector<2x1x8x32xf32>
    %31 = arith.subf %27, %30 : vector<2x1x8x32xf32>
    %32 = math.exp %31 : vector<2x1x8x32xf32>
    %cst_14 = arith.constant dense<0.000000e+00> : vector<2x1x32xf32>
    %33 = vector.multi_reduction <add>, %32, %cst_14 [2] : vector<2x1x8x32xf32> to vector<2x1x32xf32>
    %34 = vector.shape_cast %33 : vector<2x1x32xf32> to vector<2x1x1x32xf32>
    %35 = arith.mulf %32, %21 : vector<2x1x8x32xf32>
    %cst_15 = arith.constant dense<0.000000e+00> : vector<2x1x32xf32>
    %36 = vector.multi_reduction <add>, %35, %cst_15 [2] : vector<2x1x8x32xf32> to vector<2x1x32xf32>
    %37 = vector.shape_cast %36 : vector<2x1x32xf32> to vector<2x1x1x32xf32>
    %38 = tpu.reciprocal %34 : vector<2x1x1x32xf32> -> vector<2x1x1x32xf32>
    %39 = arith.mulf %37, %38 : vector<2x1x1x32xf32>
    %40 = vector.shape_cast %39 : vector<2x1x1x32xf32> to vector<2x32xf32>
    %c0_16 = arith.constant 0 : index
    %c96 = arith.constant 96 : index
    %41 = vector.load %arg1[%c0_16, %c96] : memref<32x128xf32, #tpu.memory_space<vmem>>, vector<32x32xf32>
    %cst_17 = arith.constant dense<0.000000e+00> : vector<2x32xf32>
    %42 = tpu.matmul %40, %41, %cst_17 {dimension_numbers = #tpu.dot_dimension_numbers<[1], [0], [0], [1], [0, 0, 1, 1], [], []>} : vector<2x32xf32>, vector<32x32xf32>, vector<2x32xf32> -> vector<2x32xf32>
    %43 = vector.broadcast %5 : vector<1x32xf32> to vector<2x32xf32>
    %44 = arith.addf %42, %43 : vector<2x32xf32>
    %45 = arith.addf %1, %44 : vector<2x32xf32>
    %cst_18 = arith.constant dense<0.000000e+00> : vector<2xf32>
    %46 = vector.multi_reduction <add>, %45, %cst_18 [1] : vector<2x32xf32> to vector<2xf32>
    %47 = vector.shape_cast %46 : vector<2xf32> to vector<2x1xf32>
    %cst_19 = arith.constant 3.200000e+01 : f32
    %48 = vector.broadcast %cst_19 : f32 to vector<2x1xf32>
    %49 = arith.divf %47, %48 : vector<2x1xf32>
    %50 = vector.broadcast %49 : vector<2x1xf32> to vector<2x32xf32>
    %51 = arith.subf %45, %50 : vector<2x32xf32>
    %52 = arith.mulf %51, %51 : vector<2x32xf32>
    %cst_20 = arith.constant dense<0.000000e+00> : vector<2xf32>
    %53 = vector.multi_reduction <add>, %52, %cst_20 [1] : vector<2x32xf32> to vector<2xf32>
    %54 = vector.shape_cast %53 : vector<2xf32> to vector<2x1xf32>
    %cst_21 = arith.constant 3.200000e+01 : f32
    %55 = vector.broadcast %cst_21 : f32 to vector<2x1xf32>
    %56 = arith.divf %54, %55 : vector<2x1xf32>
    %57 = vector.broadcast %49 : vector<2x1xf32> to vector<2x32xf32>
    %58 = arith.subf %45, %57 : vector<2x32xf32>
    %cst_22 = arith.constant 9.99999974E-6 : f32
    %59 = vector.broadcast %cst_22 : f32 to vector<2x1xf32>
    %60 = arith.addf %56, %59 : vector<2x1xf32>
    %61 = math.rsqrt %60 : vector<2x1xf32>
    %62 = vector.broadcast %61 : vector<2x1xf32> to vector<2x32xf32>
    %63 = arith.mulf %58, %62 : vector<2x32xf32>
    %64 = vector.broadcast %6 : vector<1x32xf32> to vector<2x32xf32>
    %65 = arith.mulf %63, %64 : vector<2x32xf32>
    %66 = vector.broadcast %7 : vector<1x32xf32> to vector<2x32xf32>
    %67 = arith.addf %65, %66 : vector<2x32xf32>
    %c0_23 = arith.constant 0 : index
    %c0_24 = arith.constant 0 : index
    %68 = vector.load %arg4[%c0_23, %c0_24] : memref<2x32xf32, #tpu.memory_space<vmem>>, vector<2x32xf32>
    tpu.vector_store %arg4[%c0_23, %c0_24], %67 {strides = array<i32>} : memref<2x32xf32, #tpu.memory_space<vmem>>, vector<2x32xf32>,
    return
  }
}

</mosaic_0001>

<bundles_post_ra>
// kernel: tpu_custom_call.1
= control target key start
LH: loop header
LB: loop body
LE: loop exit
PB: predicated region body
PF: predicated region fallthrough
CT: control target
= control target key end

     0   :  { %9 = vsyncpa [#allocation3], 0  ;;  %s968_s0 = inlined_call_operand.hbm [shape: f32[18,32], index: 0, kind: input, shape index: {}]   ;;  %s969_s1 = inlined_call_operand.hbm [shape: f32[32,128], index: 1, kind: input, shape index: {}]   ;;  %s970_s2 = inlined_call_operand.hbm [shape: f32[8,32], index: 2, kind: input, shape index: {}]   ;;  %s971_s3 = inlined_call_operand.hbm [shape: f32[32,32], index: 3, kind: input, shape index: {}]   ;;  %s972_s4 = inlined_call_operand.hbm [shape: f32[2,32], index: 4, kind: output, shape index: {}]  }
   0x1   :  { %10 = vsyncpa [#allocation6], 0 }
   0x2   :  { %11 = vsyncpa [#allocation9], 0 }
   0x3   :  { %12 = vsyncpa [#allocation4], 0  ;;  %s789_s15 = smov [#allocation5]   ;;  %s790_s17 = smov [#allocation2]  }
   0x4   :  { %s30_s16 = sshll.u32 %s789_s15, 4  ;;  %s18_s18 = sshll.u32 %s790_s17, 4  ;;  %s31_s16 = int_to_ptr.vmem [resolvable:$true] %s30_s16  ;;  %s828_s18 = int_to_ptr.vmem [resolvable:$true] %s18_s18 }
   0x5   :  { %s671_s21 = scalar_lea.hbm %s969_s1, 512 }
   0x6   :  { %p672_p0 = scmp.ne.s32.totalorder %s969_s1, %s671_s21  ;;  %p675_p1 = scmp.lt.u32.totalorder %s671_s21, %s969_s1 }
   0x8   :  { %p677_p2 = pnand %p675_p1, %p672_p0 }
   0xa   :  { %680 = shalt.err (!%p677_p2)
}
   0xb   :  { %s681_s26 = scalar_lea.vmem %s31_s16, 512  ;;  %p686_p4 = scmp.lt.s32.totalorder %s31_s16, %s31_s16 }
   0xc   :  { %p682_p3 = scmp.ne.s32.totalorder %s31_s16, %s681_s26  ;;  %p687_p5 = scmp.lt.s32.totalorder %s681_s26, %s681_s26 }
   0xe   :  { %p688_p6 = por %p687_p5, %p686_p4 }
  0x10   :  { %p689_p7 = pnand %p688_p6, %p682_p3 }
  0x12   :  { %692 = shalt.err (!%p689_p7)
}
  0x13   :  { %s791_s27 = smov 128   ;;  %s792_s28 = smov 8  }
  0x14   :  { %36 = dma.hbm_to_vmem [thread:$0]  %s969_s1, 512, %s31_s16, [#allocation6], %s791_s27, %s791_s27, %s792_s28  }
  0x15   :  { %s693_s7 = scalar_lea.hbm %s968_s0, 384 }
  0x16   :  { %p694_p8 = scmp.ne.s32.totalorder %s968_s0, %s693_s7  ;;  %p697_p9 = scmp.lt.u32.totalorder %s693_s7, %s968_s0 }
  0x18   :  { %p699_p10 = pnand %p697_p9, %p694_p8 }
  0x1a   :  { %702 = shalt.err (!%p699_p10)
}
  0x1b   :  { %s703_s12 = scalar_lea.vmem %s828_s18, 384  ;;  %p708_p12 = scmp.lt.s32.totalorder %s828_s18, %s828_s18 }
  0x1c   :  { %p704_p11 = scmp.ne.s32.totalorder %s828_s18, %s703_s12  ;;  %p709_p13 = scmp.lt.s32.totalorder %s703_s12, %s703_s12 }
  0x1e   :  { %p710_p0 = por %p709_p13, %p708_p12 }
  0x20   :  { %p711_p1 = pnand %p710_p0, %p704_p11 }
  0x22   :  { %714 = shalt.err (!%p711_p1)
}
  0x23   :  { %24 = dma.hbm_to_vmem [thread:$0]  %s968_s0, 384, %s828_s18, [#allocation3], %s791_s27, %s791_s27, %s792_s28  }
  0x24   :  { %s793_s14 = smov [#allocation7]   ;;  %s794_s16 = smov [#allocation8]  }
  0x25   :  { %s43_s15 = sshll.u32 %s793_s14, 4  ;;  %s52_s17 = sshll.u32 %s794_s16, 4  ;;  %s44_s15 = int_to_ptr.vmem [resolvable:$true] %s43_s15  ;;  %s865_s17 = int_to_ptr.vmem [resolvable:$true] %s52_s17 }
  0x26   :  { %s715_s21 = scalar_lea.hbm %s970_s2, 128 }
  0x27   :  { %p716_p2 = scmp.ne.s32.totalorder %s970_s2, %s715_s21  ;;  %p719_p3 = scmp.lt.u32.totalorder %s715_s21, %s970_s2 }
  0x29   :  { %p721_p4 = pnand %p719_p3, %p716_p2 }
  0x2b   :  { %724 = shalt.err (!%p721_p4)
}
  0x2c   :  { %s725_s0 = scalar_lea.vmem %s44_s15, 128  ;;  %p730_p6 = scmp.lt.s32.totalorder %s44_s15, %s44_s15 }
  0x2d   :  { %p726_p5 = scmp.ne.s32.totalorder %s44_s15, %s725_s0  ;;  %p731_p7 = scmp.lt.s32.totalorder %s725_s0, %s725_s0 }
  0x2f   :  { %p732_p8 = por %p731_p7, %p730_p6 }
  0x31   :  { %p733_p9 = pnand %p732_p8, %p726_p5 }
  0x33   :  { %736 = shalt.err (!%p733_p9)
}
  0x34   :  { %46 = dma.hbm_to_vmem [thread:$0]  %s970_s2, 128, %s44_s15, [#allocation6]  }
  0x35   :  { %s737_s5 = scalar_lea.hbm %s971_s3, 512 }
  0x36   :  { %p738_p10 = scmp.ne.s32.totalorder %s971_s3, %s737_s5  ;;  %p741_p11 = scmp.lt.u32.totalorder %s737_s5, %s971_s3 }
  0x38   :  { %p743_p12 = pnand %p741_p11, %p738_p10 }
  0x3a   :  { %746 = shalt.err (!%p743_p12)
}
  0x3b   :  { %s747_s10 = scalar_lea.vmem %s865_s17, 512  ;;  %p752_p0 = scmp.lt.s32.totalorder %s865_s17, %s865_s17 }
  0x3c   :  { %p748_p13 = scmp.ne.s32.totalorder %s865_s17, %s747_s10  ;;  %p753_p1 = scmp.lt.s32.totalorder %s747_s10, %s747_s10 }
  0x3e   :  { %p754_p2 = por %p753_p1, %p752_p0 }
  0x40   :  { %p755_p3 = pnand %p754_p2, %p748_p13 }
  0x42   :  { %758 = shalt.err (!%p755_p3)
}
  0x43   :  { %58 = dma.hbm_to_vmem [thread:$0]  %s971_s3, 512, %s865_s17, [#allocation9], %s791_s27, %s791_s27, %s792_s28  }
  0x44   :  { %781 = dma.done.wait [#allocation3], 384  }
  0x45   :  { %782 = vsyncadd [#allocation3], 4294966912 }
  0x46   :  { %783 = dma.done.wait [#allocation6], 640  }
  0x47   :  { %784 = vsyncadd [#allocation6], 4294966656 }
  0x48   :  { %785 = dma.done.wait [#allocation9], 512  }
  0x49   :  { %786 = vsyncadd [#allocation9], 4294966784  ;;  %v795_v0 = vmov 0.0|0.0   ;;  %vm796_vm0 = vmmov 0   ;;  %v797_v1 = vmov 0.0   ;;  %v902_v2 = vld [vmem:[#allocation5] sm:$0xff]  ;;  %v205_v36 = vlaneseq }
  0x4a   :  { %617 = vmatprep.subr.bf16.mxu0 %v795_v0  ;;  %586 = vmatprep.mubr.msk.f32.mxu0 %vm796_vm0, %v797_v1  ;;  %v904_v3 = vld [vmem:[#allocation5 + $0x8] sm:$0xff]  ;;  %v906_v4 = vld [vmem:[#allocation5 + $0x10] sm:$0xff]  ;;  %v910_v6 = vld [vmem:[#allocation5 + $0x18] sm:$0xff]  ;;  %s798_s3 = smov 32   ;;  %vm84_vm1 = vcmask 261120   ;;  %vm227_vm2 = vcmask 1045504  }
  0x4b   :  { %v618_v5 = vpack.c.bf16 %v904_v3, %v902_v2  ;;  %v552_v7 = vld [vmem:[#allocation7 + $0x1] ss:$0 sm:$0xff]  ;;  %v621_v8 = vpack.c.bf16 %v910_v6, %v906_v4  ;;  %v916_v9 = vld [vmem:[#allocation2] sm:$0xff]  ;;  %v72_v10 = vld [vmem:[#allocation2 + $0x8] sm:$0xff]  ;;  %s799_s27 = smov 96   ;;  %s800_s28 = smov 64   ;;  %v651_v62 = vpack.i.bf16 %v904_v3, %v902_v2  ;;  %v656_v63 = vpack.i.bf16 %v910_v6, %v906_v4 }
  0x4c   :  { %184 = vrot.lane.b32.xlu0 %v552_v7, %s798_s3  ;;  %v73_v11 = vld [vmem:[#allocation2 + $0x10] sm:$0x3]  ;;  %v259_v12 = vld [vmem:[#allocation8] sm:$0xff]  ;;  %v260_v13 = vld [vmem:[#allocation8 + $0x8] sm:$0xff]  ;;  %v801_v34 = vmov 1966171168  }
  0x4d   :  { %619 = vmatpush3.bf16.msra.mxu0 %v618_v5  ;;  %v623_v14 = vpack.c.bf16 %v260_v13, %v259_v12  ;;  %v261_v15 = vld [vmem:[#allocation8 + $0x10] sm:$0xff]  ;;  %v262_v16 = vld [vmem:[#allocation8 + $0x18] sm:$0xff]  ;;  %v203_v35 = vunpack.c.l.s4 %v801_v34  ;;  %v206_v38 = vshrl.u32 %v205_v36, 7  ;;  %vm414_vm3 = vcmask 1041409   ;;  %s802_s12 = smov [#allocation10]  }
  0x4e   :  { %620 = vmatprep.subr.bf16.mxu0 %v795_v0  ;;  %v627_v17 = vpack.c.bf16 %v262_v16, %v261_v15  ;;  %v553_v33 = vld [vmem:[#allocation7 + $0x2] ss:$0 sm:$0xff]  ;;  %v551_v39 = vld [vmem:[#allocation7] ss:$0 sm:$0xff]  ;;  %vm505_vm4 = vcmask 254976   ;;  %s537_s1 = sshll.u32 %s802_s12, 4  ;;  %s538_s1 = int_to_ptr.vmem [resolvable:$true] %s537_s1 }
  0x4f   :  { %624 = vmatprep.subr.bf16.mxu1 %v623_v14  ;;  %v204_v37 = vunpack.c.0.s8 %v203_v35  ;;  %v243_v44 = vsub.s32 0, %v206_v38  ;;  %s759_s13 = scalar_lea.vmem %s538_s1, 32  ;;  %p764_p5 = scmp.lt.s32.totalorder %s538_s1, %s538_s1 }
  0x50   :  { %626 = vmatpush3.bf16.msra.mxu1 %v623_v14  ;;  %p760_p4 = scmp.ne.s32.totalorder %s538_s1, %s759_s13  ;;  %p765_p6 = scmp.lt.s32.totalorder %s759_s13, %s759_s13 }
  0x51   :  { %622 = vmatpush3.bf16.msra.mxu0 %v621_v8  ;;  %628 = vmatprep.subr.bf16.mxu1 %v627_v17  ;;  %v207_v41 = vsub.s32 %v204_v37, %v206_v38 }
  0x52   :  { %p766_p7 = por %p765_p6, %p764_p5 }
  0x54   :  { %587 = vmatmul.mubr.msk.f32.vlgmr.msra.gmra.mrb[0].mxu0 %vm84_vm1, %v916_v9  ;;  %630 = vmatpush3.bf16.msra.mxu1 %v627_v17  ;;  %p767_p8 = pnand %p766_p7, %p760_p4 }
  0x55   :  { %589 = vmatprep.mubr.msk.f32.mxu0 %vm796_vm0, %v797_v1  ;;  %631 = vmatprep.subr.bf16.mxu1 %v795_v0 }
  0x58   :  { %590 = vmatmul.mubr.msk.f32.gmra.mrb[2].mxu0 %vm84_vm1, %v72_v10 }
  0x59   :  { %592 = vmatprep.mubr.msk.f32.mxu0 %vm796_vm0, %v797_v1 }
  0x5c   :  { %593 = vmatmul.mubr.msk.f32.gmra.mrb[4].mxu0 %vm84_vm1, %v73_v11 }
  0xbe   :  { %v185_v18 = vpop.permute.xlu0 %184 }
 0x127   :  { %v160_v19 = vpop.f32.mrb[0].mxu0 }
 0x128   :  { %v588_v20 = vpop.f32.mrb[1].mxu0  ;;  %v187_v21 = vadd.f32 %v185_v18, %v160_v19  ;;  %v178_v40 = vadd.f32 %v551_v39, %v160_v19 }
 0x12a   :  { %v228_v25 = vrot.slane %v187_v21, 2  ;;  %v208_v42 = vrot.slane %v178_v40, %v207_v41 }
 0x12b   :  { %v165_v22 = vpop.f32.mrb[2].mxu0 }
 0x12c   :  { %v188_v23 = vadd.f32 %v185_v18, %v165_v22  ;;  %v591_v24 = vpop.f32.mrb[3].mxu0  ;;  %v216_v43 = vrot.slane %v208_v42, %v207_v41  ;;  %v209_v45 = vcombine.high %v208_v42, %v208_v42 }
 0x12e   :  { %v229_v26 = vrot.slane %v188_v23, 2  ;;  %v244_v46 = vrot.slane %v216_v43, %v243_v44  ;;  %v223_v47 = vrot.slane %v209_v45, %v207_v41 }
 0x12f   :  { %v170_v27 = vpop.f32.mrb[4].mxu0 }
 0x130   :  { %v189_v28 = vadd.f32 %v185_v18, %v170_v27  ;;  %v594_v29 = vpop.f32.mrb[5].mxu0  ;;  %v230_v30 = vsel %vm227_vm2, %v228_v25, %v229_v26  ;;  %v248_v50 = vrot.slane %v223_v47, %v243_v44 }
 0x131   :  { %251 = vrot.lane.b32.xlu0 %v230_v30, %s799_s27 }
 0x132   :  { %v231_v31 = vrot.slane %v189_v28, 2 }
 0x134   :  { %v232_v32 = vsel %vm227_vm2, %v229_v26, %v231_v31 }
 0x135   :  { %253 = vrot.lane.b32.xlu1 %v232_v32, %s799_s27 }
 0x139   :  { %195 = vrot.lane.b32.xlu1 %v553_v33, %s800_s28 }
 0x1a3   :  { %v252_v48 = vpop.permute.xlu0 %251 }
 0x1a4   :  { %v257_v49 = vmul.f32 %v252_v48, %v244_v46 }
 0x1a6   :  { %603 = vmatprep.mubr.msk.f32.mxu1 %vm84_vm1, %v257_v49 }
 0x1a7   :  { %v254_v51 = vpop.permute.xlu1 %253 }
 0x1a8   :  { %v258_v52 = vmul.f32 %v254_v51, %v248_v50 }
 0x1aa   :  { %604 = vmatmul.mubr.msk.f32.vlgmr.msra.gmra.mrb[0].mxu1 %vm84_vm1, %v258_v52 }
 0x1ab   :  { %v196_v53 = vpop.permute.xlu1 %195  ;;  %614 = vmatprep.mubr.msk.f32.mxu1 %vm796_vm0, %v797_v1 }
 0x1ac   :  { %v198_v54 = vadd.f32 %v196_v53, %v160_v19  ;;  %v199_v55 = vadd.f32 %v196_v53, %v165_v22  ;;  %v200_v56 = vadd.f32 %v196_v53, %v170_v27 }
 0x1ae   :  { %v236_v57 = vrot.slane %v198_v54, 2  ;;  %v237_v58 = vrot.slane %v199_v55, 2  ;;  %v239_v59 = vrot.slane %v200_v56, 2 }
 0x1b0   :  { %v240_v60 = vsel %vm227_vm2, %v237_v58, %v239_v59  ;;  %v238_v61 = vsel %vm227_vm2, %v236_v57, %v237_v58 }
 0x1b1   :  { %380 = vrot.lane.b32.xlu1 %v240_v60, %s800_s28  ;;  %378 = vrot.lane.b32.xlu0 %v238_v61, %s800_s28 }
 0x1b5   :  { %652 = vrot.lane.b32.xlu0 %v651_v62, %s798_s3  ;;  %657 = vrot.lane.b32.xlu1 %v656_v63, %s798_s3 }
 0x223   :  { %v381_v1 = vpop.permute.xlu1 %380  ;;  %v379_v5 = vpop.permute.xlu0 %378 }
 0x227   :  { %v653_v7 = vpop.permute.xlu0 %652  ;;  %v658_v8 = vpop.permute.xlu1 %657 }
 0x228   :  { %v655_v10 = vunpack.i.h.bf16 %v653_v7  ;;  %v654_v11 = vunpack.i.l.bf16 %v653_v7  ;;  %v660_v12 = vunpack.i.h.bf16 %v658_v8  ;;  %v659_v13 = vunpack.i.l.bf16 %v658_v8 }
 0x22a   :  { %v632_v14 = vpack.c.bf16 %v655_v10, %v654_v11  ;;  %v635_v15 = vpack.c.bf16 %v660_v12, %v659_v13  ;;  %v556_v10 = vld [vmem:[#allocation7 + $0x3] ss:$0 sm:$0xff] }
 0x22c   :  { %633 = vmatpush3.bf16.msra.mxu1 %v632_v14 }
 0x22d   :  { %634 = vmatprep.subr.bf16.mxu1 %v795_v0 }
 0x230   :  { %636 = vmatpush3.bf16.msra.mxu1 %v635_v15 }
 0x27d   :  { %v605_v2 = vpop.f32.mrb[0].mxu1 }
 0x27e   :  { %v351_v3 = vsel %vm84_vm1, %v605_v2, -inf  ;;  %v335_v4 = vpop.f32.mrb[1].mxu1 }
 0x27f   :  { %v352_v6 = vrot.slane %v351_v3, 4  ;;  %v344_v16 = vsel %vm84_vm1, %v335_v4, -inf }
 0x280   :  { %v345_v17 = vrot.slane %v344_v16, 4 }
 0x281   :  { %v353_v18 = vmax.f32 %v351_v3, %v352_v6 }
 0x282   :  { %v346_v19 = vmax.f32 %v344_v16, %v345_v17 }
 0x283   :  { %v354_v20 = vrot.slane %v353_v18, 2 }
 0x284   :  { %v347_v21 = vrot.slane %v346_v19, 2 }
 0x285   :  { %v355_v22 = vmax.f32 %v353_v18, %v354_v20 }
 0x286   :  { %v348_v23 = vmax.f32 %v346_v19, %v347_v21  ;;  %v558_v21 = vld [vmem:[#allocation7 + $0x4] ss:$0 sm:$0xff] }
 0x287   :  { %v356_v24 = vrot.slane %v355_v22, 1 }
 0x288   :  { %v349_v25 = vrot.slane %v348_v23, 1 }
 0x289   :  { %v357_v26 = vmax.f32 %v355_v22, %v356_v24 }
 0x28a   :  { %v350_v27 = vmax.f32 %v348_v23, %v349_v25  ;;  %v559_v23 = vld [vmem:[#allocation7 + $0x5] ss:$0 sm:$0xff] }
 0x28b   :  { %v359_v0 = vsub.f32 %v605_v2, %v357_v26 }
 0x28c   :  { %v358_v28 = vsub.f32 %v335_v4, %v350_v27 }
 0x28d   :  { %v362_v29 = vmul.f32 1.442695, %v359_v0 }
 0x28e   :  { %v360_v30 = vmul.f32 1.442695, %v358_v28 }
 0x28f   :  { %661 = vpow2.f32 %v362_v29 }
 0x290   :  { %663 = vpow2.f32 %v360_v30 }
 0x299   :  { %v662_v31 = vpop.eup %661 }
 0x29a   :  { %v664_v32 = vpop.eup %663  ;;  %v371_v33 = vsel %vm84_vm1, %v662_v31, 0.0  ;;  %v385_v34 = vmul.f32 %v662_v31, %v381_v1 }
 0x29b   :  { %v372_v35 = vrot.slane %v371_v33, 4  ;;  %v364_v36 = vsel %vm84_vm1, %v664_v32, 0.0  ;;  %v384_v37 = vmul.f32 %v664_v32, %v379_v5 }
 0x29c   :  { %v393_v38 = vsel %vm84_vm1, %v385_v34, 0.0  ;;  %v365_v39 = vrot.slane %v364_v36, 4 }
 0x29d   :  { %v373_v40 = vadd.f32 %v372_v35, %v371_v33  ;;  %v394_v41 = vrot.slane %v393_v38, 4  ;;  %v386_v42 = vsel %vm84_vm1, %v384_v37, 0.0 }
 0x29e   :  { %v366_v43 = vadd.f32 %v365_v39, %v364_v36  ;;  %v387_v44 = vrot.slane %v386_v42, 4 }
 0x29f   :  { %v374_v45 = vrot.slane %v373_v40, 2  ;;  %v395_v47 = vadd.f32 %v394_v41, %v393_v38 }
 0x2a0   :  { %v367_v46 = vrot.slane %v366_v43, 2  ;;  %v388_v49 = vadd.f32 %v387_v44, %v386_v42 }
 0x2a1   :  { %v375_v48 = vadd.f32 %v374_v45, %v373_v40  ;;  %v396_v53 = vrot.slane %v395_v47, 2 }
 0x2a2   :  { %v368_v50 = vadd.f32 %v367_v46, %v366_v43  ;;  %v389_v55 = vrot.slane %v388_v49, 2 }
 0x2a3   :  { %v376_v51 = vrot.slane %v375_v48, 1  ;;  %v397_v57 = vadd.f32 %v396_v53, %v395_v47 }
 0x2a4   :  { %v369_v52 = vrot.slane %v368_v50, 1  ;;  %v390_v58 = vadd.f32 %v389_v55, %v388_v49 }
 0x2a5   :  { %v377_v54 = vadd.f32 %v376_v51, %v375_v48  ;;  %v398_v59 = vrot.slane %v397_v57, 1 }
 0x2a6   :  { %v370_v56 = vadd.f32 %v369_v52, %v368_v50  ;;  %v391_v60 = vrot.slane %v390_v58, 1 }
 0x2a7   :  { %665 = vrcp.f32 %v377_v54  ;;  %v399_v61 = vadd.f32 %v398_v59, %v397_v57 }
 0x2a8   :  { %667 = vrcp.f32 %v370_v56  ;;  %v392_v63 = vadd.f32 %v391_v60, %v390_v58 }
 0x2b1   :  { %v666_v62 = vpop.eup %665 }
 0x2b2   :  { %v668_v1 = vpop.eup %667  ;;  %v403_v5 = vmul.f32 %v666_v62, %v399_v61 }
 0x2b3   :  { %v402_v7 = vmul.f32 %v668_v1, %v392_v63 }
 0x2b5   :  { %v415_v8 = vsel %vm414_vm3, %v403_v5, %v402_v7 }
 0x2b6   :  { %615 = vmatmul.mubr.msk.f32.vlgmr.msra.gmra.mrb[2].mxu1 %vm84_vm1, %v415_v8 }
 0x389   :  { %v500_v11 = vpop.f32.mrb[2].mxu1 }
 0x38a   :  { %v501_v12 = vadd.f32 %v556_v10, %v500_v11  ;;  %v616_v13 = vpop.f32.mrb[3].mxu1 }
 0x38c   :  { %v504_v14 = vadd.f32 %v501_v12, %v916_v9 }
 0x38e   :  { %v506_v15 = vsel %vm505_vm4, %v504_v14, 0.0 }
 0x38f   :  { %507 = vadd.xlane.f32.xlu0 %v506_v15 }
 0x41c   :  { %v508_v2 = vpop.xlane.xlu0 %507 }
 0x41d   :  { %v510_v3 = vmul.f32 0.03125, %v508_v2 }
 0x41f   :  { %v511_v4 = vsub.f32 %v504_v14, %v510_v3 }
 0x421   :  { %v512_v6 = vmul.f32 %v511_v4, %v511_v4 }
 0x423   :  { %v513_v16 = vsel %vm505_vm4, %v512_v6, 0.0 }
 0x424   :  { %514 = vadd.xlane.f32.xlu1 %v513_v16 }
 0x4b1   :  { %v515_v17 = vpop.xlane.xlu1 %514 }
 0x4b2   :  { %v516_v18 = vmul.f32 0.03125, %v515_v17 }
 0x4b4   :  { %v517_v19 = vadd.f32 1e-05, %v516_v18 }
 0x4b6   :  { %669 = vrsqrt.f32 %v517_v19 }
 0x4c0   :  { %v670_v20 = vpop.eup %669 }
 0x4c1   :  { %v519_v22 = vmul.f32 %v670_v20, %v511_v4 }
 0x4c3   :  { %v524_v9 = vmul.f32 %v558_v21, %v519_v22 }
 0x4c5   :  { %v529_v24 = vadd.f32 %v559_v23, %v524_v9 }
 0x4c7   :  { %530 = vst.msk [vmem:[#allocation10] sm:$0x3] %vm505_vm4, %v529_v24 }
 0x4c8   :  { %770 = shalt.err (!%p767_p8)
}
 0x4c9   :  { %s771_s16 = scalar_lea.hbm %s972_s4, 32 }
 0x4ca   :  { %p772_p9 = scmp.ne.s32.totalorder %s972_s4, %s771_s16  ;;  %p775_p10 = scmp.lt.u32.totalorder %s771_s16, %s972_s4 }
 0x4cc   :  { %p777_p11 = pnand %p775_p10, %p772_p9 }
 0x4ce   :  { %780 = shalt.err (!%p777_p11)
}
 0x4cf   :  { %540 = dma.vmem_to_hbm [thread:$0]  %s538_s1, 32, %s972_s4, [#allocation4]  }
 0x4d0   :  { %787 = dma.done.wait [#allocation4], 32  }
 0x4d1   :  { %788 = vsyncadd [#allocation4], 4294967264 }
 0x4d2   :  { %544 = vsyncpa [#allocation3], 1 }
 0x4d3   :  { %545 = vsyncpa [#allocation6], 1 }
 0x4d4   :  { %546 = vsyncpa [#allocation9], 1 }
 0x4d5   :  { %547 = vsyncpa [#allocation4], 1 }

</bundles_post_ra>
